<compile_context>
chip_gen: v7x
topology: tpu7x:2x2x1
jax: 0.10.0
libtpu: 0.0.40
codegen_flags: <defaults>
</compile_context>

<pallas_src>
import jax
import jax.numpy as jnp
from jax.experimental import pallas as pl
from jax.experimental.pallas import tpu as pltpu

NUM_CLASSES = 6      # len(label_dict_from_config_file('hand_gesture.yaml')) - fixed in-script
HIDDEN = 128
IN_FEATURES = 63     # 21 hand landmarks x 3 coords; nn.Flatten is identity on 2-D input
CLS_PAD = 128        # final-layer class dim zero-padded for a lane-dense MXU matmul
MAGNITUDE = 1.0      # CACLoss(magnitude=1)
BN_EPS = 1e-5
MAX_BATCH_TILE = 512


def _mlp_cac_kernel(x_ref, w1_ref, b1_ref, w2_ref, b2_ref, w3_ref, b3_ref,
                    w4_ref, b4_ref, w5_ref, b5_ref, out_ref):
    # Matmul operands bf16 (fewer MXU passes), accumulation + epilogue in f32.
    x = x_ref[...].astype(jnp.bfloat16)                                     # (TB, 63)

    # Linear(63,128) + ReLU
    h = jnp.dot(x, w1_ref[...], preferred_element_type=jnp.float32) + b1_ref[...]
    h = jnp.maximum(h, 0.0)

    # BatchNorm1d (eval mode) is folded into w2/b2 in prepare_params().
    # Dropout layers are identity in eval mode.
    h = jnp.maximum(jnp.dot(h.astype(jnp.bfloat16), w2_ref[...],
                            preferred_element_type=jnp.float32) + b2_ref[...], 0.0)
    h = jnp.maximum(jnp.dot(h.astype(jnp.bfloat16), w3_ref[...],
                            preferred_element_type=jnp.float32) + b3_ref[...], 0.0)
    h = jnp.maximum(jnp.dot(h.astype(jnp.bfloat16), w4_ref[...],
                            preferred_element_type=jnp.float32) + b4_ref[...], 0.0)

    # Final Linear(128, C), class dim zero-padded to CLS_PAD -> padded logits are exactly 0.
    logits = jnp.dot(h.astype(jnp.bfloat16), w5_ref[...],
                     preferred_element_type=jnp.float32) + b5_ref[...]      # (TB, CLS_PAD)

    # CAC distances via the expansion ||l - m*e_c||^2 = ||l||^2 - 2*m*l_c + m^2.
    # Padded logit lanes are 0, so the squared-norm reduction is exact over the C
    # real classes.  (Expansion can lose precision for distances << 1; negligible
    # relative to the bf16 matmul error here.)
    sq = jnp.sum(logits * logits, axis=-1, keepdims=True)                   # (TB, 1)
    d2 = sq - (2.0 * MAGNITUDE) * logits[:, :NUM_CLASSES] + MAGNITUDE * MAGNITUDE
    out_ref[...] = jnp.sqrt(jnp.maximum(d2, 0.0))                           # (TB, C)


def init_params(key):
    ks = jax.random.split(key, 12)
    p = {}
    p["w1"] = jax.random.normal(ks[0], (IN_FEATURES, HIDDEN), jnp.float32) * 0.1
    p["b1"] = jax.random.normal(ks[1], (HIDDEN,), jnp.float32) * 0.01
    p["gamma"] = 1.0 + 0.05 * jax.random.normal(ks[2], (HIDDEN,), jnp.float32)
    p["beta"] = 0.01 * jax.random.normal(ks[3], (HIDDEN,), jnp.float32)
    p["rmean"] = 0.01 * jax.random.normal(ks[4], (HIDDEN,), jnp.float32)
    p["rvar"] = jnp.abs(1.0 + 0.05 * jax.random.normal(ks[5], (HIDDEN,), jnp.float32))
    p["w2"] = jax.random.normal(ks[6], (HIDDEN, HIDDEN), jnp.float32) * 0.05
    p["b2"] = jax.random.normal(ks[7], (HIDDEN,), jnp.float32) * 0.01
    p["w3"] = jax.random.normal(ks[8], (HIDDEN, HIDDEN), jnp.float32) * 0.05
    p["b3"] = jax.random.normal(ks[9], (HIDDEN,), jnp.float32) * 0.01
    p["w4"] = jax.random.normal(ks[10], (HIDDEN, HIDDEN), jnp.float32) * 0.05
    p["b4"] = jax.random.normal(ks[11], (HIDDEN,), jnp.float32) * 0.01
    kw5, kb5 = jax.random.split(jax.random.fold_in(key, 99))
    p["w5"] = jax.random.normal(kw5, (HIDDEN, NUM_CLASSES), jnp.float32) * 0.05
    p["b5"] = jax.random.normal(kb5, (NUM_CLASSES,), jnp.float32) * 0.01
    return p


def prepare_params(p):
    """One-time parameter preparation (outside the per-call path):
       - fold eval-mode BatchNorm1d into the second Linear,
       - cast all matmul weights to bf16,
       - zero-pad the final layer's class dim 6 -> CLS_PAD,
       - reshape biases to (1, N) lane rows (kept f32)."""
    s = p["gamma"] * jax.lax.rsqrt(p["rvar"] + BN_EPS)            # (128,)
    t = p["beta"] - p["rmean"] * s                                # (128,)
    w2f = s[:, None] * p["w2"]                                    # scale fold
    b2f = p["b2"] + t @ p["w2"]                                   # shift fold

    w5p = jnp.zeros((HIDDEN, CLS_PAD), jnp.float32).at[:, :NUM_CLASSES].set(p["w5"])
    b5p = jnp.zeros((CLS_PAD,), jnp.float32).at[:NUM_CLASSES].set(p["b5"])

    row = lambda v: v.reshape(1, -1).astype(jnp.float32)
    bf = lambda w: w.astype(jnp.bfloat16)
    return (
        bf(p["w1"]), row(p["b1"]),
        bf(w2f), row(b2f),
        bf(p["w3"]), row(p["b3"]),
        bf(p["w4"]), row(p["b4"]),
        bf(w5p), row(b5p),
    )


@jax.jit
def forward(x, prep):
    """x: (B, 63) float32.  prep: output of prepare_params().  Returns (B, NUM_CLASSES)."""
    B = x.shape[0]
    TB = B if B <= MAX_BATCH_TILE else MAX_BATCH_TILE
    grid = (pl.cdiv(B, TB),)

    resident = lambda shape: pl.BlockSpec(shape, lambda i: (0, 0))
    in_specs = [pl.BlockSpec((TB, IN_FEATURES), lambda i: (i, 0))] + [
        resident(a.shape) for a in prep
    ]
    out_specs = pl.BlockSpec((TB, NUM_CLASSES), lambda i: (i, 0))

    param_bytes = sum(int(a.size) * a.dtype.itemsize for a in prep)
    cost = pl.CostEstimate(
        flops=2 * B * (IN_FEATURES * HIDDEN + 3 * HIDDEN * HIDDEN + HIDDEN * CLS_PAD),
        transcendentals=B * NUM_CLASSES,
        bytes_accessed=B * (IN_FEATURES + NUM_CLASSES) * 4 + param_bytes,
    )

    return pl.pallas_call(
        _mlp_cac_kernel,
        out_shape=jax.ShapeDtypeStruct((B, NUM_CLASSES), jnp.float32),
        grid=grid,
        in_specs=in_specs,
        out_specs=out_specs,
        compiler_params=pltpu.CompilerParams(
            dimension_semantics=("parallel",)),   # megacore sharding on v7x
        cost_estimate=cost,
    )(x, *prep)


def forward_reference(x, p):
    """Plain-JAX f32 reference (original, un-folded params; direct anchor differences)."""
    h = jnp.maximum(x @ p["w1"] + p["b1"], 0.0)
    h = (h - p["rmean"]) / jnp.sqrt(p["rvar"] + BN_EPS) * p["gamma"] + p["beta"]
    h = jnp.maximum(h @ p["w2"] + p["b2"], 0.0)
    h = jnp.maximum(h @ p["w3"] + p["b3"], 0.0)
    h = jnp.maximum(h @ p["w4"] + p["b4"], 0.0)
    logits = h @ p["w5"] + p["b5"]                                # (B, C)
    anchors = MAGNITUDE * jnp.eye(NUM_CLASSES, dtype=jnp.float32)
    diff = logits[:, None, :] - anchors[None, :, :]               # (B, C, C)
    return jnp.sqrt(jnp.sum(diff * diff, axis=-1))


if __name__ == "__main__":
    key = jax.random.PRNGKey(0)
    kx, kp = jax.random.split(key)
    B = 8
    x = jax.random.normal(kx, (B, IN_FEATURES), jnp.float32)
    params = init_params(kp)
    prep = prepare_params(params)            # done once, not per forward call

    dist = forward(x, prep)
    jax.block_until_ready(dist)

    ref = forward_reference(x, params)
    assert dist.shape == (B, NUM_CLASSES), dist.shape
    max_err = float(jnp.max(jnp.abs(dist - ref)))
    # bf16 matmul operands (f32 accumulation) -> looser tolerance than pure f32.
    assert jnp.allclose(dist, ref, atol=5e-2, rtol=5e-2), max_err

    print("KERNEL_OK")
</pallas_src>

<mosaic_0001>
module attributes {stable_mosaic.version = 11 : i64} {
  func.func @_mlp_cac_kernel(%arg0: i32, %arg1: memref<8x63xf32, #tpu.memory_space<vmem>>, %arg2: memref<63x128xbf16, #tpu.memory_space<vmem>>, %arg3: memref<1x128xf32, #tpu.memory_space<vmem>>, %arg4: memref<128x128xbf16, #tpu.memory_space<vmem>>, %arg5: memref<1x128xf32, #tpu.memory_space<vmem>>, %arg6: memref<128x128xbf16, #tpu.memory_space<vmem>>, %arg7: memref<1x128xf32, #tpu.memory_space<vmem>>, %arg8: memref<128x128xbf16, #tpu.memory_space<vmem>>, %arg9: memref<1x128xf32, #tpu.memory_space<vmem>>, %arg10: memref<128x128xbf16, #tpu.memory_space<vmem>>, %arg11: memref<1x128xf32, #tpu.memory_space<vmem>>, %arg12: memref<8x6xf32, #tpu.memory_space<vmem>>) attributes {dimension_semantics = [#tpu.dimension_semantics<parallel>], iteration_bounds = array<i64: 1>, scalar_prefetch = 0 : i64, scratch_operands = 0 : i64, tpu.core_type = #tpu.core_type<tc>, window_params = [{transform_indices = @transform_0, window_bounds = array<i64: 8, 63>}, {pipeline_mode = #tpu.pipeline_mode<synchronous>, transform_indices = @transform_1, window_bounds = array<i64: 63, 128>}, {pipeline_mode = #tpu.pipeline_mode<synchronous>, transform_indices = @transform_2, window_bounds = array<i64: 1, 128>}, {pipeline_mode = #tpu.pipeline_mode<synchronous>, transform_indices = @transform_3, window_bounds = array<i64: 128, 128>}, {pipeline_mode = #tpu.pipeline_mode<synchronous>, transform_indices = @transform_4, window_bounds = array<i64: 1, 128>}, {pipeline_mode = #tpu.pipeline_mode<synchronous>, transform_indices = @transform_5, window_bounds = array<i64: 128, 128>}, {pipeline_mode = #tpu.pipeline_mode<synchronous>, transform_indices = @transform_6, window_bounds = array<i64: 1, 128>}, {pipeline_mode = #tpu.pipeline_mode<synchronous>, transform_indices = @transform_7, window_bounds = array<i64: 128, 128>}, {pipeline_mode = #tpu.pipeline_mode<synchronous>, transform_indices = @transform_8, window_bounds = array<i64: 1, 128>}, {pipeline_mode = #tpu.pipeline_mode<synchronous>, transform_indices = @transform_9, window_bounds = array<i64: 128, 128>}, {pipeline_mode = #tpu.pipeline_mode<synchronous>, transform_indices = @transform_10, window_bounds = array<i64: 1, 128>}, {transform_indices = @transform_11, window_bounds = array<i64: 8, 6>}]} {
    %c0 = arith.constant 0 : index
    %c0_0 = arith.constant 0 : index
    %0 = vector.load %arg1[%c0, %c0_0] : memref<8x63xf32, #tpu.memory_space<vmem>>, vector<8x63xf32>
    %1 = arith.truncf %0 : vector<8x63xf32> to vector<8x63xbf16>
    %c0_1 = arith.constant 0 : index
    %c0_2 = arith.constant 0 : index
    %2 = vector.load %arg2[%c0_1, %c0_2] : memref<63x128xbf16, #tpu.memory_space<vmem>>, vector<63x128xbf16>
    %cst = arith.constant dense<0.000000e+00> : vector<8x128xf32>
    %3 = tpu.matmul %1, %2, %cst {dimension_numbers = #tpu.dot_dimension_numbers<[1], [0], [0], [1], [0, 0, 1, 1], [], []>} : vector<8x63xbf16>, vector<63x128xbf16>, vector<8x128xf32> -> vector<8x128xf32>
    %c0_3 = arith.constant 0 : index
    %c0_4 = arith.constant 0 : index
    %4 = vector.load %arg3[%c0_3, %c0_4] : memref<1x128xf32, #tpu.memory_space<vmem>>, vector<1x128xf32>
    %5 = vector.broadcast %4 : vector<1x128xf32> to vector<8x128xf32>
    %6 = arith.addf %3, %5 : vector<8x128xf32>
    %cst_5 = arith.constant 0.000000e+00 : f32
    %7 = vector.broadcast %cst_5 : f32 to vector<8x128xf32>
    %8 = arith.maximumf %6, %7 : vector<8x128xf32>
    %9 = arith.truncf %8 : vector<8x128xf32> to vector<8x128xbf16>
    %c0_6 = arith.constant 0 : index
    %c0_7 = arith.constant 0 : index
    %10 = vector.load %arg4[%c0_6, %c0_7] : memref<128x128xbf16, #tpu.memory_space<vmem>>, vector<128x128xbf16>
    %cst_8 = arith.constant dense<0.000000e+00> : vector<8x128xf32>
    %11 = tpu.matmul %9, %10, %cst_8 {dimension_numbers = #tpu.dot_dimension_numbers<[1], [0], [0], [1], [0, 0, 1, 1], [], []>} : vector<8x128xbf16>, vector<128x128xbf16>, vector<8x128xf32> -> vector<8x128xf32>
    %c0_9 = arith.constant 0 : index
    %c0_10 = arith.constant 0 : index
    %12 = vector.load %arg5[%c0_9, %c0_10] : memref<1x128xf32, #tpu.memory_space<vmem>>, vector<1x128xf32>
    %13 = vector.broadcast %12 : vector<1x128xf32> to vector<8x128xf32>
    %14 = arith.addf %11, %13 : vector<8x128xf32>
    %cst_11 = arith.constant 0.000000e+00 : f32
    %15 = vector.broadcast %cst_11 : f32 to vector<8x128xf32>
    %16 = arith.maximumf %14, %15 : vector<8x128xf32>
    %17 = arith.truncf %16 : vector<8x128xf32> to vector<8x128xbf16>
    %c0_12 = arith.constant 0 : index
    %c0_13 = arith.constant 0 : index
    %18 = vector.load %arg6[%c0_12, %c0_13] : memref<128x128xbf16, #tpu.memory_space<vmem>>, vector<128x128xbf16>
    %cst_14 = arith.constant dense<0.000000e+00> : vector<8x128xf32>
    %19 = tpu.matmul %17, %18, %cst_14 {dimension_numbers = #tpu.dot_dimension_numbers<[1], [0], [0], [1], [0, 0, 1, 1], [], []>} : vector<8x128xbf16>, vector<128x128xbf16>, vector<8x128xf32> -> vector<8x128xf32>
    %c0_15 = arith.constant 0 : index
    %c0_16 = arith.constant 0 : index
    %20 = vector.load %arg7[%c0_15, %c0_16] : memref<1x128xf32, #tpu.memory_space<vmem>>, vector<1x128xf32>
    %21 = vector.broadcast %20 : vector<1x128xf32> to vector<8x128xf32>
    %22 = arith.addf %19, %21 : vector<8x128xf32>
    %cst_17 = arith.constant 0.000000e+00 : f32
    %23 = vector.broadcast %cst_17 : f32 to vector<8x128xf32>
    %24 = arith.maximumf %22, %23 : vector<8x128xf32>
    %25 = arith.truncf %24 : vector<8x128xf32> to vector<8x128xbf16>
    %c0_18 = arith.constant 0 : index
    %c0_19 = arith.constant 0 : index
    %26 = vector.load %arg8[%c0_18, %c0_19] : memref<128x128xbf16, #tpu.memory_space<vmem>>, vector<128x128xbf16>
    %cst_20 = arith.constant dense<0.000000e+00> : vector<8x128xf32>
    %27 = tpu.matmul %25, %26, %cst_20 {dimension_numbers = #tpu.dot_dimension_numbers<[1], [0], [0], [1], [0, 0, 1, 1], [], []>} : vector<8x128xbf16>, vector<128x128xbf16>, vector<8x128xf32> -> vector<8x128xf32>
    %c0_21 = arith.constant 0 : index
    %c0_22 = arith.constant 0 : index
    %28 = vector.load %arg9[%c0_21, %c0_22] : memref<1x128xf32, #tpu.memory_space<vmem>>, vector<1x128xf32>
    %29 = vector.broadcast %28 : vector<1x128xf32> to vector<8x128xf32>
    %30 = arith.addf %27, %29 : vector<8x128xf32>
    %cst_23 = arith.constant 0.000000e+00 : f32
    %31 = vector.broadcast %cst_23 : f32 to vector<8x128xf32>
    %32 = arith.maximumf %30, %31 : vector<8x128xf32>
    %33 = arith.truncf %32 : vector<8x128xf32> to vector<8x128xbf16>
    %c0_24 = arith.constant 0 : index
    %c0_25 = arith.constant 0 : index
    %34 = vector.load %arg10[%c0_24, %c0_25] : memref<128x128xbf16, #tpu.memory_space<vmem>>, vector<128x128xbf16>
    %cst_26 = arith.constant dense<0.000000e+00> : vector<8x128xf32>
    %35 = tpu.matmul %33, %34, %cst_26 {dimension_numbers = #tpu.dot_dimension_numbers<[1], [0], [0], [1], [0, 0, 1, 1], [], []>} : vector<8x128xbf16>, vector<128x128xbf16>, vector<8x128xf32> -> vector<8x128xf32>
    %c0_27 = arith.constant 0 : index
    %c0_28 = arith.constant 0 : index
    %36 = vector.load %arg11[%c0_27, %c0_28] : memref<1x128xf32, #tpu.memory_space<vmem>>, vector<1x128xf32>
    %37 = vector.broadcast %36 : vector<1x128xf32> to vector<8x128xf32>
    %38 = arith.addf %35, %37 : vector<8x128xf32>
    %39 = arith.mulf %38, %38 : vector<8x128xf32>
    %cst_29 = arith.constant dense<0.000000e+00> : vector<8xf32>
    %40 = vector.multi_reduction <add>, %39, %cst_29 [1] : vector<8x128xf32> to vector<8xf32>
    %41 = vector.shape_cast %40 : vector<8xf32> to vector<8x1xf32>
    %42 = vector.extract_strided_slice %38 {offsets = [0, 0], sizes = [8, 6], strides = [1, 1]} : vector<8x128xf32> to vector<8x6xf32>
    %cst_30 = arith.constant 2.000000e+00 : f32
    %43 = vector.broadcast %cst_30 : f32 to vector<8x6xf32>
    %44 = arith.mulf %43, %42 : vector<8x6xf32>
    %45 = vector.broadcast %41 : vector<8x1xf32> to vector<8x6xf32>
    %46 = arith.subf %45, %44 : vector<8x6xf32>
    %cst_31 = arith.constant 1.000000e+00 : f32
    %47 = vector.broadcast %cst_31 : f32 to vector<8x6xf32>
    %48 = arith.addf %46, %47 : vector<8x6xf32>
    %cst_32 = arith.constant 0.000000e+00 : f32
    %49 = vector.broadcast %cst_32 : f32 to vector<8x6xf32>
    %50 = arith.maximumf %48, %49 : vector<8x6xf32>
    %51 = math.sqrt %50 : vector<8x6xf32>
    %c0_33 = arith.constant 0 : index
    %c0_34 = arith.constant 0 : index
    %52 = vector.load %arg12[%c0_33, %c0_34] : memref<8x6xf32, #tpu.memory_space<vmem>>, vector<8x6xf32>
    tpu.vector_store %arg12[%c0_33, %c0_34], %51 {strides = array<i32>} : memref<8x6xf32, #tpu.memory_space<vmem>>, vector<8x6xf32>,
    return
  }
  func.func @transform_0(%arg0: i32) -> (i32, i32) {
    %c0_i32 = arith.constant 0 : i32
    %c0_i32_0 = arith.constant 0 : i32
    return %arg0, %c0_i32 : i32, i32
  }
  func.func @transform_1(%arg0: i32) -> (i32, i32) {
    %c0_i32 = arith.constant 0 : i32
    %c0_i32_0 = arith.constant 0 : i32
    %c0_i32_1 = arith.constant 0 : i32
    return %c0_i32, %c0_i32_0 : i32, i32
  }
  func.func @transform_2(%arg0: i32) -> (i32, i32) {
    %c0_i32 = arith.constant 0 : i32
    %c0_i32_0 = arith.constant 0 : i32
    %c0_i32_1 = arith.constant 0 : i32
    return %c0_i32, %c0_i32_0 : i32, i32
  }
  func.func @transform_3(%arg0: i32) -> (i32, i32) {
    %c0_i32 = arith.constant 0 : i32
    %c0_i32_0 = arith.constant 0 : i32
    %c0_i32_1 = arith.constant 0 : i32
    return %c0_i32, %c0_i32_0 : i32, i32
  }
  func.func @transform_4(%arg0: i32) -> (i32, i32) {
    %c0_i32 = arith.constant 0 : i32
    %c0_i32_0 = arith.constant 0 : i32
    %c0_i32_1 = arith.constant 0 : i32
    return %c0_i32, %c0_i32_0 : i32, i32
  }
  func.func @transform_5(%arg0: i32) -> (i32, i32) {
    %c0_i32 = arith.constant 0 : i32
    %c0_i32_0 = arith.constant 0 : i32
    %c0_i32_1 = arith.constant 0 : i32
    return %c0_i32, %c0_i32_0 : i32, i32
  }
  func.func @transform_6(%arg0: i32) -> (i32, i32) {
    %c0_i32 = arith.constant 0 : i32
    %c0_i32_0 = arith.constant 0 : i32
    %c0_i32_1 = arith.constant 0 : i32
    return %c0_i32, %c0_i32_0 : i32, i32
  }
  func.func @transform_7(%arg0: i32) -> (i32, i32) {
    %c0_i32 = arith.constant 0 : i32
    %c0_i32_0 = arith.constant 0 : i32
    %c0_i32_1 = arith.constant 0 : i32
    return %c0_i32, %c0_i32_0 : i32, i32
  }
  func.func @transform_8(%arg0: i32) -> (i32, i32) {
    %c0_i32 = arith.constant 0 : i32
    %c0_i32_0 = arith.constant 0 : i32
    %c0_i32_1 = arith.constant 0 : i32
    return %c0_i32, %c0_i32_0 : i32, i32
  }
  func.func @transform_9(%arg0: i32) -> (i32, i32) {
    %c0_i32 = arith.constant 0 : i32
    %c0_i32_0 = arith.constant 0 : i32
    %c0_i32_1 = arith.constant 0 : i32
    return %c0_i32, %c0_i32_0 : i32, i32
  }
  func.func @transform_10(%arg0: i32) -> (i32, i32) {
    %c0_i32 = arith.constant 0 : i32
    %c0_i32_0 = arith.constant 0 : i32
    %c0_i32_1 = arith.constant 0 : i32
    return %c0_i32, %c0_i32_0 : i32, i32
  }
  func.func @transform_11(%arg0: i32) -> (i32, i32) {
    %c0_i32 = arith.constant 0 : i32
    %c0_i32_0 = arith.constant 0 : i32
    return %arg0, %c0_i32 : i32, i32
  }
}

</mosaic_0001>

<bundles_post_ra>
// kernel: forward.1
= control target key start
LH: loop header
LB: loop body
LE: loop exit
PB: predicated region body
PF: predicated region fallthrough
CT: control target
= control target key end

     0   :  { %16 = vsyncpa [#allocation3], 0  ;;  %s1318_s0 = inlined_call_operand.hbm [shape: f32[8,63], index: 0, kind: input, shape index: {}]   ;;  %s1319_s1 = inlined_call_operand.hbm [shape: bf16[63,128], index: 1, kind: input, shape index: {}]   ;;  %s1320_s2 = inlined_call_operand.vmem [shape: f32[1,128], index: 2, kind: input, shape index: {}]   ;;  %s1321_s3 = inlined_call_operand.hbm [shape: bf16[128,128], index: 3, kind: input, shape index: {}]   ;;  %s1322_s4 = inlined_call_operand.vmem [shape: f32[1,128], index: 4, kind: input, shape index: {}]   ;;  %s1323_s5 = inlined_call_operand.hbm [shape: bf16[128,128], index: 5, kind: input, shape index: {}]   ;;  %s1324_s6 = inlined_call_operand.vmem [shape: f32[1,128], index: 6, kind: input, shape index: {}]   ;;  %s1325_s7 = inlined_call_operand.hbm [shape: bf16[128,128], index: 7, kind: input, shape index: {}]   ;;  %s1326_s8 = inlined_call_operand.vmem [shape: f32[1,128], index: 8, kind: input, shape index: {}]   ;;  %s1327_s9 = inlined_call_operand.hbm [shape: bf16[128,128], index: 9, kind: input, shape index: {}]   ;;  %s1328_s10 = inlined_call_operand.vmem [shape: f32[1,128], index: 10, kind: input, shape index: {}]   ;;  %s1329_s11 = inlined_call_operand.hbm [shape: f32[8,6], index: 11, kind: output, shape index: {}]  }
   0x1   :  { %17 = vsyncpa [#allocation6], 0 }
   0x2   :  { %18 = vsyncpa [#allocation9], 0 }
   0x3   :  { %19 = vsyncpa [#allocation12], 0 }
   0x4   :  { %20 = vsyncpa [#allocation4], 0  ;;  %s1086_s17 = smov [#allocation5]   ;;  %s922_s21 = scalar_lea.hbm %s1319_s1, 512 }
   0x5   :  { %s36_s18 = sshll.u32 %s1086_s17, 4  ;;  %p923_p0 = scmp.ne.s32.totalorder %s1319_s1, %s922_s21  ;;  %s37_s18 = int_to_ptr.vmem [resolvable:$true] %s36_s18 }
   0x6   :  { %p926_p1 = scmp.lt.u32.totalorder %s922_s21, %s1319_s1 }
   0x8   :  { %p928_p2 = pnand %p926_p1, %p923_p0 }
   0xa   :  { %931 = shalt.err (!%p928_p2)
}
   0xb   :  { %s932_s26 = scalar_lea.vmem %s37_s18, 512  ;;  %p937_p4 = scmp.lt.s32.totalorder %s37_s18, %s37_s18 }
   0xc   :  { %p933_p3 = scmp.ne.s32.totalorder %s37_s18, %s932_s26  ;;  %p938_p5 = scmp.lt.s32.totalorder %s932_s26, %s932_s26 }
   0xe   :  { %p939_p6 = por %p938_p5, %p937_p4 }
  0x10   :  { %p940_p7 = pnand %p939_p6, %p933_p3 }
  0x12   :  { %943 = shalt.err (!%p940_p7)
}
  0x13   :  { %s1087_s27 = smov 64   ;;  %s1088_s28 = smov 4  }
  0x14   :  { %42 = dma.hbm_to_vmem [thread:$0]  %s1319_s1, 512, %s37_s18, [#allocation6], %s1087_s27, %s1087_s27, %s1088_s28  }
  0x15   :  { %s1089_s12 = smov [#allocation8]   ;;  %s1090_s14 = smov [#allocation2]  }
  0x16   :  { %s64_s13 = sshll.u32 %s1089_s12, 4  ;;  %s27_s15 = sshll.u32 %s1090_s14, 4  ;;  %s65_s13 = int_to_ptr.vmem [resolvable:$true] %s64_s13  ;;  %s28_s15 = int_to_ptr.vmem [resolvable:$true] %s27_s15 }
  0x17   :  { %s944_s19 = scalar_lea.hbm %s1323_s5, 1024 }
  0x18   :  { %p945_p8 = scmp.ne.s32.totalorder %s1323_s5, %s944_s19  ;;  %p948_p9 = scmp.lt.u32.totalorder %s944_s19, %s1323_s5 }
  0x1a   :  { %p950_p10 = pnand %p948_p9, %p945_p8 }
  0x1c   :  { %953 = shalt.err (!%p950_p10)
}
  0x1d   :  { %s954_s1 = scalar_lea.vmem %s65_s13, 1024  ;;  %p959_p12 = scmp.lt.s32.totalorder %s65_s13, %s65_s13 }
  0x1e   :  { %p955_p11 = scmp.ne.s32.totalorder %s65_s13, %s954_s1  ;;  %p960_p13 = scmp.lt.s32.totalorder %s954_s1, %s954_s1 }
  0x20   :  { %p961_p0 = por %p960_p13, %p959_p12 }
  0x22   :  { %p962_p1 = pnand %p961_p0, %p955_p11 }
  0x24   :  { %965 = shalt.err (!%p962_p1)
}
  0x25   :  { %70 = dma.hbm_to_vmem [thread:$0]  %s1323_s5, 1024, %s65_s13, [#allocation9], %s1087_s27, %s1087_s27, %s1088_s28  }
  0x26   :  { %s966_s29 = scalar_lea.hbm %s1318_s0, 128 }
  0x27   :  { %p967_p2 = scmp.ne.s32.totalorder %s1318_s0, %s966_s29  ;;  %p970_p3 = scmp.lt.u32.totalorder %s966_s29, %s1318_s0 }
  0x29   :  { %p972_p4 = pnand %p970_p3, %p967_p2 }
  0x2b   :  { %975 = shalt.err (!%p972_p4)
}
  0x2c   :  { %s976_s17 = scalar_lea.vmem %s28_s15, 128  ;;  %p981_p6 = scmp.lt.s32.totalorder %s28_s15, %s28_s15 }
  0x2d   :  { %p977_p5 = scmp.ne.s32.totalorder %s28_s15, %s976_s17  ;;  %p982_p7 = scmp.lt.s32.totalorder %s976_s17, %s976_s17 }
  0x2f   :  { %p983_p8 = por %p982_p7, %p981_p6 }
  0x31   :  { %p984_p9 = pnand %p983_p8, %p977_p5 }
  0x33   :  { %987 = shalt.err (!%p984_p9)
}
  0x34   :  { %30 = dma.hbm_to_vmem [thread:$0]  %s1318_s0, 128, %s28_s15, [#allocation3]  }
  0x35   :  { %s1091_s19 = smov [#allocation7]   ;;  %s1092_s21 = smov [#allocation10]  }
  0x36   :  { %s50_s20 = sshll.u32 %s1091_s19, 4  ;;  %s78_s22 = sshll.u32 %s1092_s21, 4  ;;  %s51_s20 = int_to_ptr.vmem [resolvable:$true] %s50_s20  ;;  %s79_s22 = int_to_ptr.vmem [resolvable:$true] %s78_s22 }
  0x37   :  { %s988_s18 = scalar_lea.hbm %s1321_s3, 1024 }
  0x38   :  { %p989_p10 = scmp.ne.s32.totalorder %s1321_s3, %s988_s18  ;;  %p992_p11 = scmp.lt.u32.totalorder %s988_s18, %s1321_s3 }
  0x3a   :  { %p994_p12 = pnand %p992_p11, %p989_p10 }
  0x3c   :  { %997 = shalt.err (!%p994_p12)
}
  0x3d   :  { %s998_s0 = scalar_lea.vmem %s51_s20, 1024  ;;  %p1003_p0 = scmp.lt.s32.totalorder %s51_s20, %s51_s20 }
  0x3e   :  { %p999_p13 = scmp.ne.s32.totalorder %s51_s20, %s998_s0  ;;  %p1004_p1 = scmp.lt.s32.totalorder %s998_s0, %s998_s0 }
  0x40   :  { %p1005_p2 = por %p1004_p1, %p1003_p0 }
  0x42   :  { %p1006_p3 = pnand %p1005_p2, %p999_p13 }
  0x44   :  { %1009 = shalt.err (!%p1006_p3)
}
  0x45   :  { %56 = dma.hbm_to_vmem [thread:$0]  %s1321_s3, 1024, %s51_s20, [#allocation6], %s1087_s27, %s1087_s27, %s1088_s28  }
  0x46   :  { %s1010_s16 = scalar_lea.hbm %s1325_s7, 1024 }
  0x47   :  { %p1011_p4 = scmp.ne.s32.totalorder %s1325_s7, %s1010_s16  ;;  %p1014_p5 = scmp.lt.u32.totalorder %s1010_s16, %s1325_s7 }
  0x49   :  { %p1016_p6 = pnand %p1014_p5, %p1011_p4 }
  0x4b   :  { %1019 = shalt.err (!%p1016_p6)
}
  0x4c   :  { %s1020_s21 = scalar_lea.vmem %s79_s22, 1024  ;;  %p1025_p8 = scmp.lt.s32.totalorder %s79_s22, %s79_s22 }
  0x4d   :  { %p1021_p7 = scmp.ne.s32.totalorder %s79_s22, %s1020_s21  ;;  %p1026_p9 = scmp.lt.s32.totalorder %s1020_s21, %s1020_s21 }
  0x4f   :  { %p1027_p10 = por %p1026_p9, %p1025_p8 }
  0x51   :  { %p1028_p11 = pnand %p1027_p10, %p1021_p7 }
  0x53   :  { %1031 = shalt.err (!%p1028_p11)
}
  0x54   :  { %84 = dma.hbm_to_vmem [thread:$0]  %s1325_s7, 1024, %s79_s22, [#allocation9], %s1087_s27, %s1087_s27, %s1088_s28  }
  0x55   :  { %s1093_s23 = smov [#allocation11]   ;;  %s1032_s25 = scalar_lea.hbm %s1327_s9, 1024 }
  0x56   :  { %s92_s1 = sshll.u32 %s1093_s23, 4  ;;  %p1033_p12 = scmp.ne.s32.totalorder %s1327_s9, %s1032_s25  ;;  %s93_s1 = int_to_ptr.vmem [resolvable:$true] %s92_s1 }
  0x57   :  { %p1036_p13 = scmp.lt.u32.totalorder %s1032_s25, %s1327_s9 }
  0x59   :  { %p1038_p0 = pnand %p1036_p13, %p1033_p12 }
  0x5b   :  { %1041 = shalt.err (!%p1038_p0)
}
  0x5c   :  { %s1042_s30 = scalar_lea.vmem %s93_s1, 1024  ;;  %p1047_p2 = scmp.lt.s32.totalorder %s93_s1, %s93_s1 }
  0x5d   :  { %p1043_p1 = scmp.ne.s32.totalorder %s93_s1, %s1042_s30  ;;  %p1048_p3 = scmp.lt.s32.totalorder %s1042_s30, %s1042_s30 }
  0x5f   :  { %p1049_p4 = por %p1048_p3, %p1047_p2 }
  0x61   :  { %p1050_p5 = pnand %p1049_p4, %p1043_p1 }
  0x63   :  { %1053 = shalt.err (!%p1050_p5)
}
  0x64   :  { %98 = dma.hbm_to_vmem [thread:$0]  %s1327_s9, 1024, %s93_s1, [#allocation12], %s1087_s27, %s1087_s27, %s1088_s28  }
  0x65   :  { %1076 = dma.done.wait [#allocation3], 128  }
  0x66   :  { %1077 = vsyncadd [#allocation3], 4294967168 }
  0x67   :  { %1078 = dma.done.wait [#allocation6], 1536  }
  0x68   :  { %1079 = vsyncadd [#allocation6], 4294965760 }
  0x69   :  { %1080 = dma.done.wait [#allocation9], 2048  }
  0x6a   :  { %1081 = vsyncadd [#allocation9], 4294965248 }
  0x6b   :  { %1082 = dma.done.wait [#allocation12], 1024  }
  0x6c   :  { %1083 = vsyncadd [#allocation12], 4294966272  ;;  %v1094_v0 = vmov 0.0   ;;  %vm1095_vm0 = vmmov 0   ;;  %v884_v1 = vld [vmem:[#allocation5] sm:$0xff]   ;;  %vm164_vm1 = vcmask 1046528  }
  0x6d   :  { %780 = vmatprep.subr.bf16.mxu0 %v1094_v0  ;;  %792 = vmatprep.subr.bf16.mxu1 %v1094_v0  ;;  %v885_v2 = vld [vmem:[#allocation5 + $0x8] sm:$0xff]   ;;  %vm165_vm2 = vcmask 1047552   ;;  %v886_v3 = vld [vmem:[#allocation5 + $0x10] sm:$0xff]   ;;  %v1096_v4 = vmov 65535   ;;  %v888_v6 = vld [vmem:[#allocation7] sm:$0xff]   ;;  %vm160_vm3 = vcmask 515072  }
  0x6e   :  { %788 = vmatprep.mubr.msk.bf16.mxu0 %vm1095_vm0, %v1094_v0  ;;  %808 = vmatprep.mubr.msk.bf16.mxu1 %vm1095_vm0, %v1094_v0  ;;  %v166_v5 = vsel %vm164_vm1, 4294967295, %v1096_v4  ;;  %v887_v7 = vld [vmem:[#allocation5 + $0x18] sm:$0xff]   ;;  %v889_v9 = vld [vmem:[#allocation7 + $0x8] sm:$0xff]   ;;  %v890_v12 = vld [vmem:[#allocation7 + $0x10] sm:$0xff]   ;;  %vm677_vm5 = vcmask 48128  }
  0x6f   :  { %781 = vmatpush3.bf16.msra.mxu0 %v884_v1  ;;  %v167_v8 = vsel %vm165_vm2, %v166_v5, 0  ;;  %793 = vmatpush3.bf16.msra.mxu1 %v888_v6  ;;  %v120_v11 = vld [vmem:[#allocation2] sm:$0xff]  ;;  %v892_v15 = vld [vmem:[#allocation7 + $0x20] sm:$0xff]   ;;  %v893_v16 = vld [vmem:[#allocation7 + $0x28] sm:$0xff]  }
  0x70   :  { %782 = vmatprep.subr.bf16.mxu0 %v1094_v0  ;;  %794 = vmatprep.subr.bf16.mxu1 %v1094_v0  ;;  %v169_v10 = vand.u32 %v887_v7, %v167_v8  ;;  %v121_v13 = vpack.c.bf16 %v120_v11, %v120_v11  ;;  %v891_v14 = vld [vmem:[#allocation7 + $0x18] sm:$0xff]   ;;  %v894_v17 = vld [vmem:[#allocation7 + $0x30] sm:$0xff]   ;;  %v896_v19 = vld [vmem:[#allocation8] sm:$0xff]  }
  0x71   :  { %v895_v18 = vld [vmem:[#allocation7 + $0x38] sm:$0xff]   ;;  %v897_v20 = vld [vmem:[#allocation8 + $0x8] sm:$0xff]   ;;  %v898_v21 = vld [vmem:[#allocation8 + $0x10] sm:$0xff]  }
  0x72   :  { %v899_v22 = vld [vmem:[#allocation8 + $0x18] sm:$0xff]   ;;  %v900_v23 = vld [vmem:[#allocation8 + $0x20] sm:$0xff]   ;;  %v901_v24 = vld [vmem:[#allocation8 + $0x28] sm:$0xff]  }
  0x73   :  { %783 = vmatpush3.bf16.msra.mxu0 %v885_v2  ;;  %795 = vmatpush3.bf16.msra.mxu1 %v889_v9  ;;  %v697_v25 = vld [vmem:[%s1320_s2] ss:$0 sm:$0xff]  ;;  %v902_v33 = vld [vmem:[#allocation8 + $0x30] sm:$0xff]   ;;  %v904_v35 = vld [vmem:[#allocation10] sm:$0xff]  }
  0x74   :  { %784 = vmatprep.subr.bf16.mxu0 %v1094_v0  ;;  %796 = vmatprep.subr.bf16.mxu1 %v1094_v0  ;;  %v903_v34 = vld [vmem:[#allocation8 + $0x38] sm:$0xff]   ;;  %v905_v36 = vld [vmem:[#allocation10 + $0x8] sm:$0xff]   ;;  %v906_v37 = vld [vmem:[#allocation10 + $0x10] sm:$0xff]  }
  0x75   :  { %v907_v38 = vld [vmem:[#allocation10 + $0x18] sm:$0xff]   ;;  %v908_v39 = vld [vmem:[#allocation10 + $0x20] sm:$0xff]   ;;  %v909_v40 = vld [vmem:[#allocation10 + $0x28] sm:$0xff]  }
  0x76   :  { %v703_v41 = vld [vmem:[%s1322_s4] ss:$0 sm:$0xff]  ;;  %v910_v49 = vld [vmem:[#allocation10 + $0x30] sm:$0xff]   ;;  %v912_v51 = vld [vmem:[#allocation11] sm:$0xff]  }
  0x77   :  { %785 = vmatpush3.bf16.msra.mxu0 %v886_v3  ;;  %797 = vmatpush3.bf16.msra.mxu1 %v890_v12  ;;  %v911_v50 = vld [vmem:[#allocation10 + $0x38] sm:$0xff]   ;;  %v913_v52 = vld [vmem:[#allocation11 + $0x8] sm:$0xff]   ;;  %v914_v53 = vld [vmem:[#allocation11 + $0x10] sm:$0xff]  }
  0x78   :  { %786 = vmatprep.subr.bf16.mxu0 %v1094_v0  ;;  %798 = vmatprep.subr.bf16.mxu1 %v1094_v0  ;;  %v915_v54 = vld [vmem:[#allocation11 + $0x18] sm:$0xff]   ;;  %v916_v55 = vld [vmem:[#allocation11 + $0x20] sm:$0xff]   ;;  %v917_v56 = vld [vmem:[#allocation11 + $0x28] sm:$0xff]  }
  0x79   :  { %v712_v57 = vld [vmem:[%s1324_s6] ss:$0 sm:$0xff]  ;;  %v918_v2 = vld [vmem:[#allocation11 + $0x30] sm:$0xff]  }
  0x7a   :  { %v919_v3 = vld [vmem:[#allocation11 + $0x38] sm:$0xff]  }
  0x7b   :  { %787 = vmatpush3.bf16.msra.mxu0 %v169_v10  ;;  %799 = vmatpush3.bf16.msra.mxu1 %v891_v14  ;;  %v721_v4 = vld [vmem:[%s1326_s8] ss:$0 sm:$0xff]  ;;  %s1097_s8 = smov [#allocation13]  }
  0x7c   :  { %812 = vmatprep.subr.bf16.mxu0 %v1094_v0  ;;  %800 = vmatprep.subr.bf16.mxu1 %v1094_v0  ;;  %v730_v12 = vld [vmem:[%s1328_s10] ss:$0 sm:$0xff]  ;;  %s685_s5 = sshll.u32 %s1097_s8, 4  ;;  %s686_s5 = int_to_ptr.vmem [resolvable:$true] %s685_s5 }
  0x7d   :  { %s1054_s10 = scalar_lea.vmem %s686_s5, 128  ;;  %p1059_p7 = scmp.lt.s32.totalorder %s686_s5, %s686_s5 }
  0x7e   :  { %789 = vmatmul.mubr.msk.bf16.vlgmr.msra.gmra.mrb[0].mxu0 %vm160_vm3, %v121_v13  ;;  %p1055_p6 = scmp.ne.s32.totalorder %s686_s5, %s1054_s10  ;;  %p1060_p8 = scmp.lt.s32.totalorder %s1054_s10, %s1054_s10 }
  0x7f   :  { %828 = vmatprep.mubr.msk.bf16.mxu0 %vm1095_vm0, %v1094_v0  ;;  %801 = vmatpush3.bf16.msra.mxu1 %v892_v15 }
  0x80   :  { %802 = vmatprep.subr.bf16.mxu1 %v1094_v0  ;;  %813 = vmatpush3.bf16.msra.mxu0 %v896_v19  ;;  %p1061_p9 = por %p1060_p8, %p1059_p7 }
  0x81   :  { %814 = vmatprep.subr.bf16.mxu0 %v1094_v0 }
  0x82   :  { %p1062_p10 = pnand %p1061_p9, %p1055_p6 }
  0x83   :  { %803 = vmatpush3.bf16.msra.mxu1 %v893_v16 }
  0x84   :  { %804 = vmatprep.subr.bf16.mxu1 %v1094_v0  ;;  %815 = vmatpush3.bf16.msra.mxu0 %v897_v20 }
  0x85   :  { %816 = vmatprep.subr.bf16.mxu0 %v1094_v0 }
  0x87   :  { %805 = vmatpush3.bf16.msra.mxu1 %v894_v17 }
  0x88   :  { %806 = vmatprep.subr.bf16.mxu1 %v1094_v0  ;;  %817 = vmatpush3.bf16.msra.mxu0 %v898_v21 }
  0x89   :  { %818 = vmatprep.subr.bf16.mxu0 %v1094_v0 }
  0x8b   :  { %807 = vmatpush3.bf16.msra.mxu1 %v895_v18 }
  0x8c   :  { %832 = vmatprep.subr.bf16.mxu1 %v1094_v0  ;;  %819 = vmatpush3.bf16.msra.mxu0 %v899_v22 }
  0x8d   :  { %820 = vmatprep.subr.bf16.mxu0 %v1094_v0 }
  0x90   :  { %821 = vmatpush3.bf16.msra.mxu0 %v900_v23 }
  0x91   :  { %822 = vmatprep.subr.bf16.mxu0 %v1094_v0 }
  0x94   :  { %823 = vmatpush3.bf16.msra.mxu0 %v901_v24 }
  0x95   :  { %824 = vmatprep.subr.bf16.mxu0 %v1094_v0 }
  0x98   :  { %825 = vmatpush3.bf16.msra.mxu0 %v902_v33 }
  0x99   :  { %826 = vmatprep.subr.bf16.mxu0 %v1094_v0 }
  0x9c   :  { %827 = vmatpush3.bf16.msra.mxu0 %v903_v34 }
  0x9d   :  { %852 = vmatprep.subr.bf16.mxu0 %v1094_v0 }
 0x151   :  { %v205_v26 = vpop.f32.mrb[0].mxu0 }
 0x152   :  { %v206_v27 = vadd.f32 %v697_v25, %v205_v26  ;;  %v790_v28 = vpop.f32.mrb[1].mxu0 }
 0x153   :  { %v208_v29 = vpop.f32.mrb[2].mxu0 }
 0x154   :  { %v211_v30 = vmax.f32 %v206_v27, 0.0  ;;  %v791_v31 = vpop.f32.mrb[3].mxu0 }
 0x156   :  { %v212_v32 = vpack.c.bf16 %v211_v30, %v211_v30 }
 0x158   :  { %809 = vmatmul.mubr.bf16.vlgmr.msra.gmra.mrb[0].mxu1 %v212_v32 }
 0x159   :  { %848 = vmatprep.mubr.msk.bf16.mxu1 %vm1095_vm0, %v1094_v0  ;;  %833 = vmatpush3.bf16.msra.mxu1 %v904_v35 }
 0x15a   :  { %834 = vmatprep.subr.bf16.mxu1 %v1094_v0 }
 0x15d   :  { %835 = vmatpush3.bf16.msra.mxu1 %v905_v36 }
 0x15e   :  { %836 = vmatprep.subr.bf16.mxu1 %v1094_v0 }
 0x161   :  { %837 = vmatpush3.bf16.msra.mxu1 %v906_v37 }
 0x162   :  { %838 = vmatprep.subr.bf16.mxu1 %v1094_v0 }
 0x165   :  { %839 = vmatpush3.bf16.msra.mxu1 %v907_v38 }
 0x166   :  { %840 = vmatprep.subr.bf16.mxu1 %v1094_v0 }
 0x169   :  { %841 = vmatpush3.bf16.msra.mxu1 %v908_v39 }
 0x16a   :  { %842 = vmatprep.subr.bf16.mxu1 %v1094_v0 }
 0x16d   :  { %843 = vmatpush3.bf16.msra.mxu1 %v909_v40 }
 0x16e   :  { %844 = vmatprep.subr.bf16.mxu1 %v1094_v0 }
 0x171   :  { %845 = vmatpush3.bf16.msra.mxu1 %v910_v49 }
 0x172   :  { %846 = vmatprep.subr.bf16.mxu1 %v1094_v0 }
 0x175   :  { %847 = vmatpush3.bf16.msra.mxu1 %v911_v50 }
 0x22b   :  { %v318_v42 = vpop.f32.mrb[0].mxu1 }
 0x22c   :  { %v319_v43 = vadd.f32 %v703_v41, %v318_v42  ;;  %v810_v44 = vpop.f32.mrb[1].mxu1 }
 0x22d   :  { %v321_v45 = vpop.f32.mrb[2].mxu1 }
 0x22e   :  { %v324_v46 = vmax.f32 %v319_v43, 0.0  ;;  %v811_v47 = vpop.f32.mrb[3].mxu1 }
 0x230   :  { %v325_v48 = vpack.c.bf16 %v324_v46, %v324_v46 }
 0x232   :  { %829 = vmatmul.mubr.bf16.vlgmr.msra.gmra.mrb[4].mxu0 %v325_v48 }
 0x233   :  { %868 = vmatprep.mubr.msk.bf16.mxu0 %vm1095_vm0, %v1094_v0  ;;  %853 = vmatpush3.bf16.msra.mxu0 %v912_v51 }
 0x234   :  { %854 = vmatprep.subr.bf16.mxu0 %v1094_v0 }
 0x237   :  { %855 = vmatpush3.bf16.msra.mxu0 %v913_v52 }
 0x238   :  { %856 = vmatprep.subr.bf16.mxu0 %v1094_v0 }
 0x23b   :  { %857 = vmatpush3.bf16.msra.mxu0 %v914_v53 }
 0x23c   :  { %858 = vmatprep.subr.bf16.mxu0 %v1094_v0 }
 0x23f   :  { %859 = vmatpush3.bf16.msra.mxu0 %v915_v54 }
 0x240   :  { %860 = vmatprep.subr.bf16.mxu0 %v1094_v0 }
 0x243   :  { %861 = vmatpush3.bf16.msra.mxu0 %v916_v55 }
 0x244   :  { %862 = vmatprep.subr.bf16.mxu0 %v1094_v0 }
 0x247   :  { %863 = vmatpush3.bf16.msra.mxu0 %v917_v56 }
 0x248   :  { %864 = vmatprep.subr.bf16.mxu0 %v1094_v0 }
 0x24b   :  { %865 = vmatpush3.bf16.msra.mxu0 %v918_v2 }
 0x24c   :  { %866 = vmatprep.subr.bf16.mxu0 %v1094_v0 }
 0x24f   :  { %867 = vmatpush3.bf16.msra.mxu0 %v919_v3 }
 0x305   :  { %v431_v58 = vpop.f32.mrb[4].mxu0 }
 0x306   :  { %v432_v59 = vadd.f32 %v712_v57, %v431_v58  ;;  %v830_v60 = vpop.f32.mrb[5].mxu0 }
 0x307   :  { %v434_v61 = vpop.f32.mrb[6].mxu0 }
 0x308   :  { %v437_v62 = vmax.f32 %v432_v59, 0.0  ;;  %v831_v63 = vpop.f32.mrb[7].mxu0 }
 0x30a   :  { %v438_v1 = vpack.c.bf16 %v437_v62, %v437_v62 }
 0x30c   :  { %849 = vmatmul.mubr.bf16.vlgmr.msra.gmra.mrb[4].mxu1 %v438_v1 }
 0x3df   :  { %v544_v5 = vpop.f32.mrb[4].mxu1 }
 0x3e0   :  { %v545_v6 = vadd.f32 %v721_v4, %v544_v5  ;;  %v850_v7 = vpop.f32.mrb[5].mxu1 }
 0x3e1   :  { %v547_v8 = vpop.f32.mrb[6].mxu1 }
 0x3e2   :  { %v550_v9 = vmax.f32 %v545_v6, 0.0  ;;  %v851_v10 = vpop.f32.mrb[7].mxu1 }
 0x3e4   :  { %v551_v11 = vpack.c.bf16 %v550_v9, %v550_v9 }
 0x3e6   :  { %869 = vmatmul.mubr.bf16.vlgmr.msra.gmra.mrb[8].mxu0 %v551_v11 }
 0x4b9   :  { %v657_v13 = vpop.f32.mrb[8].mxu0 }
 0x4ba   :  { %v658_v0 = vadd.f32 %v730_v12, %v657_v13  ;;  %v870_v14 = vpop.f32.mrb[9].mxu0 }
 0x4bb   :  { %v660_v15 = vpop.f32.mrb[10].mxu0 }
 0x4bc   :  { %v871_v16 = vpop.f32.mrb[11].mxu0  ;;  %v663_v17 = vmul.f32 %v658_v0, %v658_v0  ;;  %v666_v18 = vmul.f32 2.0, %v658_v0 }
 0x4be   :  { %664 = vadd.xlane.f32.xlu0 %v663_v17 }
 0x54b   :  { %v665_v19 = vpop.xlane.xlu0 %664 }
 0x54c   :  { %v667_v20 = vsub.f32 %v665_v19, %v666_v18 }
 0x54e   :  { %v668_v21 = vadd.f32 1.0, %v667_v20 }
 0x550   :  { %v669_v22 = vmax.f32 %v668_v21, 0.0 }
 0x552   :  { %920 = vrsqrt.f32 %v669_v22  ;;  %vm672_vm4 = vcmp.eq.f32.partialorder %v669_v22, inf  ;;  %v675_v25 = vand.u32 2147483648, %v669_v22  ;;  %vm674_vm6 = vcmp.eq.f32.partialorder %v669_v22, 0.0 }
 0x55c   :  { %v921_v23 = vpop.eup %920 }
 0x55d   :  { %v671_v24 = vmul.f32 %v921_v23, %v669_v22 }
 0x55f   :  { %v673_v26 = vsel %vm672_vm4, %v669_v22, %v671_v24 }
 0x560   :  { %v676_v27 = vsel %vm674_vm6, %v675_v25, %v673_v26 }
 0x561   :  { %678 = vst.msk [vmem:[#allocation13] sm:$0xff] %vm677_vm5, %v676_v27 }
 0x562   :  { %1065 = shalt.err (!%p1062_p10)
}
 0x563   :  { %s1066_s21 = scalar_lea.hbm %s1329_s11, 128 }
 0x564   :  { %p1067_p11 = scmp.ne.s32.totalorder %s1329_s11, %s1066_s21  ;;  %p1070_p12 = scmp.lt.u32.totalorder %s1066_s21, %s1329_s11 }
 0x566   :  { %p1072_p13 = pnand %p1070_p12, %p1067_p11 }
 0x568   :  { %1075 = shalt.err (!%p1072_p13)
}
 0x569   :  { %688 = dma.vmem_to_hbm [thread:$0]  %s686_s5, 128, %s1329_s11, [#allocation4]  }
 0x56a   :  { %1084 = dma.done.wait [#allocation4], 128  }
 0x56b   :  { %1085 = vsyncadd [#allocation4], 4294967168 }
 0x56c   :  { %692 = vsyncpa [#allocation3], 1 }
 0x56d   :  { %693 = vsyncpa [#allocation6], 1 }
 0x56e   :  { %694 = vsyncpa [#allocation9], 1 }
 0x56f   :  { %695 = vsyncpa [#allocation12], 1 }
 0x570   :  { %696 = vsyncpa [#allocation4], 1 }

</bundles_post_ra>
